<compile_context>
chip_gen: v5e
topology: v5e:2x2
jax: 0.10.0
libtpu: 0.0.40
codegen_flags: <defaults>
</compile_context>

<pallas_src>
import jax
import jax.numpy as jnp
from jax.experimental import pallas as pl
from jax.experimental.pallas import tpu as pltpu

LANE = 128      # feature dims padded to multiples of the 128-wide lane axis
SUBLANE = 8     # row tile must be a multiple of the sublane count


def _round_up(x, m):
    return ((x + m - 1) // m) * m


def mlp_kernel(x_ref, w1_ref, w2_ref, o_ref):
    # First linear: bf16 operands on the MXU, f32 accumulate; ReLU on f32 (VPU).
    h = jnp.dot(x_ref[...], w1_ref[...], preferred_element_type=jnp.float32)
    h = jnp.maximum(h, 0.0)
    # Second linear: cast h to the weight dtype (bf16) to keep the MXU fed.
    out = jnp.dot(h.astype(w2_ref.dtype), w2_ref[...],
                  preferred_element_type=jnp.float32)
    o_ref[...] = out.astype(o_ref.dtype)


def mlp_forward(x, w1, w2, *, tile_n=512, compute_dtype=jnp.bfloat16):
    """Fused forward: relu(x @ w1.T) @ w2.T

    x : [N, d_in]  float32
    w1: [d_hid, d_in]   (PyTorch nn.Linear weight layout)
    w2: [d_out, d_hid]
    returns [N, d_out] float32
    """
    n, d_in = x.shape
    d_hid = w1.shape[0]
    d_out = w2.shape[0]

    # Lane-dense padding of the feature dims (multiples of 128).
    d_in_p = _round_up(d_in, LANE)
    d_hid_p = _round_up(d_hid, LANE)
    d_out_p = _round_up(d_out, LANE)

    # Row tile: multiple of 8 sublanes, no larger than the (padded) batch.
    tile_n = max(SUBLANE, _round_up(min(tile_n, n), SUBLANE))
    n_p = _round_up(n, tile_n)

    # Zero-pad operands; weights pre-transposed to [in, out] so the kernel
    # does plain x @ W on the MXU. Padded rows/cols are zero -> no effect.
    x_p = jnp.zeros((n_p, d_in_p), compute_dtype).at[:n, :d_in].set(
        x.astype(compute_dtype))
    w1t_p = jnp.zeros((d_in_p, d_hid_p), compute_dtype).at[:d_in, :d_hid].set(
        w1.T.astype(compute_dtype))
    w2t_p = jnp.zeros((d_hid_p, d_out_p), compute_dtype).at[:d_hid, :d_out].set(
        w2.T.astype(compute_dtype))

    grid = (n_p // tile_n,)

    out_p = pl.pallas_call(
        mlp_kernel,
        out_shape=jax.ShapeDtypeStruct((n_p, d_out_p), jnp.float32),
        grid_spec=pltpu.PrefetchScalarGridSpec(
            num_scalar_prefetch=0,
            grid=grid,
            in_specs=[
                # x: tiled along rows (pipelined prefetch/compute/writeback).
                pl.BlockSpec((tile_n, d_in_p), lambda i: (i, 0)),
                # Weights: constant block index -> resident in VMEM across grid.
                pl.BlockSpec((d_in_p, d_hid_p), lambda i: (0, 0)),
                pl.BlockSpec((d_hid_p, d_out_p), lambda i: (0, 0)),
            ],
            out_specs=pl.BlockSpec((tile_n, d_out_p), lambda i: (i, 0)),
        ),
        compiler_params=pltpu.CompilerParams(
            # Rows are independent -> parallel axis (megacore sharding on v7x).
            dimension_semantics=("parallel",),
            # Explicit VMEM budget with headroom; safe for v7x's 64 MiB VMEM.
            vmem_limit_bytes=48 * 1024 * 1024,
        ),
    )(x_p, w1t_p, w2t_p)

    # Strip padding.
    return out_p[:n, :d_out]


def init_linear_weight(key, out_features, in_features, dtype=jnp.float32):
    """Matches torch.nn.Linear default init: U(-1/sqrt(fan_in), 1/sqrt(fan_in))."""
    bound = 1.0 / (in_features ** 0.5)
    return jax.random.uniform(key, (out_features, in_features),
                              minval=-bound, maxval=bound, dtype=dtype)


def reference_forward(x, w1, w2):
    # Pure-JAX f32 reference matching the PyTorch semantics exactly.
    h = jnp.maximum(x @ w1.T, 0.0)
    return h @ w2.T


if __name__ == "__main__":
    # Shapes consistent with the module: many graph nodes through a small MLP.
    n_nodes = 1024          # 2 row tiles of 512 -> exercises the grid/pipeline
    input_dim = 32
    hidden_dim = 64
    output_dim = 16

    key = jax.random.PRNGKey(0)
    kx, k1, k2 = jax.random.split(key, 3)

    x = jax.random.normal(kx, (n_nodes, input_dim), dtype=jnp.float32)
    w1 = init_linear_weight(k1, hidden_dim, input_dim)   # [hid, in], PyTorch layout
    w2 = init_linear_weight(k2, output_dim, hidden_dim)  # [out, hid]

    out = mlp_forward(x, w1, w2, tile_n=512)
    out = jax.block_until_ready(out)

    ref = reference_forward(x, w1, w2)
    assert out.shape == (n_nodes, output_dim)
    # bf16 MXU operands -> relaxed tolerance vs the f32 reference.
    assert jnp.allclose(out, ref, atol=5e-2, rtol=5e-2), "mismatch vs reference"

    print("KERNEL_OK")
</pallas_src>

<mosaic_0001>
module attributes {stable_mosaic.version = 11 : i64} {
  func.func @mlp_kernel(%arg0: i32, %arg1: memref<512x128xbf16, #tpu.memory_space<vmem>>, %arg2: memref<128x128xbf16, #tpu.memory_space<vmem>>, %arg3: memref<128x128xbf16, #tpu.memory_space<vmem>>, %arg4: memref<512x128xf32, #tpu.memory_space<vmem>>) attributes {dimension_semantics = [#tpu.dimension_semantics<parallel>], iteration_bounds = array<i64: 2>, scalar_prefetch = 0 : i64, scratch_operands = 0 : i64, tpu.core_type = #tpu.core_type<tc>, window_params = [{transform_indices = @transform_0, window_bounds = array<i64: 512, 128>}, {pipeline_mode = #tpu.pipeline_mode<synchronous>, transform_indices = @transform_1, window_bounds = array<i64: 128, 128>}, {pipeline_mode = #tpu.pipeline_mode<synchronous>, transform_indices = @transform_2, window_bounds = array<i64: 128, 128>}, {transform_indices = @transform_3, window_bounds = array<i64: 512, 128>}]} {
    %c0 = arith.constant 0 : index
    %c0_0 = arith.constant 0 : index
    %0 = vector.load %arg1[%c0, %c0_0] : memref<512x128xbf16, #tpu.memory_space<vmem>>, vector<512x128xbf16>
    %c0_1 = arith.constant 0 : index
    %c0_2 = arith.constant 0 : index
    %1 = vector.load %arg2[%c0_1, %c0_2] : memref<128x128xbf16, #tpu.memory_space<vmem>>, vector<128x128xbf16>
    %cst = arith.constant dense<0.000000e+00> : vector<512x128xf32>
    %2 = tpu.matmul %0, %1, %cst {dimension_numbers = #tpu.dot_dimension_numbers<[1], [0], [0], [1], [0, 0, 1, 1], [], []>} : vector<512x128xbf16>, vector<128x128xbf16>, vector<512x128xf32> -> vector<512x128xf32>
    %cst_3 = arith.constant 0.000000e+00 : f32
    %3 = vector.broadcast %cst_3 : f32 to vector<512x128xf32>
    %4 = arith.maximumf %2, %3 : vector<512x128xf32>
    %5 = arith.truncf %4 : vector<512x128xf32> to vector<512x128xbf16>
    %c0_4 = arith.constant 0 : index
    %c0_5 = arith.constant 0 : index
    %6 = vector.load %arg3[%c0_4, %c0_5] : memref<128x128xbf16, #tpu.memory_space<vmem>>, vector<128x128xbf16>
    %cst_6 = arith.constant dense<0.000000e+00> : vector<512x128xf32>
    %7 = tpu.matmul %5, %6, %cst_6 {dimension_numbers = #tpu.dot_dimension_numbers<[1], [0], [0], [1], [0, 0, 1, 1], [], []>} : vector<512x128xbf16>, vector<128x128xbf16>, vector<512x128xf32> -> vector<512x128xf32>
    %c0_7 = arith.constant 0 : index
    %c0_8 = arith.constant 0 : index
    %8 = vector.load %arg4[%c0_7, %c0_8] : memref<512x128xf32, #tpu.memory_space<vmem>>, vector<512x128xf32>
    tpu.vector_store %arg4[%c0_7, %c0_8], %7 {strides = array<i32>} : memref<512x128xf32, #tpu.memory_space<vmem>>, vector<512x128xf32>,
    return
  }
  func.func @transform_0(%arg0: i32) -> (i32, i32) {
    %c0_i32 = arith.constant 0 : i32
    %c0_i32_0 = arith.constant 0 : i32
    return %arg0, %c0_i32 : i32, i32
  }
  func.func @transform_1(%arg0: i32) -> (i32, i32) {
    %c0_i32 = arith.constant 0 : i32
    %c0_i32_0 = arith.constant 0 : i32
    %c0_i32_1 = arith.constant 0 : i32
    return %c0_i32, %c0_i32_0 : i32, i32
  }
  func.func @transform_2(%arg0: i32) -> (i32, i32) {
    %c0_i32 = arith.constant 0 : i32
    %c0_i32_0 = arith.constant 0 : i32
    %c0_i32_1 = arith.constant 0 : i32
    return %c0_i32, %c0_i32_0 : i32, i32
  }
  func.func @transform_3(%arg0: i32) -> (i32, i32) {
    %c0_i32 = arith.constant 0 : i32
    %c0_i32_0 = arith.constant 0 : i32
    return %arg0, %c0_i32 : i32, i32
  }
}

</mosaic_0001>

<bundles_post_ra>
// kernel: tpu_custom_call.1
= control target key start
LH: loop header
LB: loop body
LE: loop exit
PB: predicated region body
PF: predicated region fallthrough
CT: control target
= control target key end

     0   :  { %8 = vsyncpa [#allocation3], 0  ;;  %s2003_s0 = inlined_call_operand.hbm [shape: bf16[1024,128], index: 0, kind: input, shape index: {}]   ;;  %s2004_s1 = inlined_call_operand.hbm [shape: bf16[128,128], index: 1, kind: input, shape index: {}]   ;;  %s2005_s2 = inlined_call_operand.hbm [shape: bf16[128,128], index: 2, kind: input, shape index: {}]   ;;  %s2006_s3 = inlined_call_operand.hbm [shape: f32[1024,128], index: 3, kind: output, shape index: {}]  }
   0x1   :  { %10 = vsyncpa [#allocation3 + $0x1], 0 }
   0x2   :  { %11 = vsyncpa [#allocation6], 0 }
   0x3   :  { %12 = vsyncpa [#allocation4], 0 }
   0x4   :  { %14 = vsyncpa [#allocation4 + $0x1], 0  ;;  %s1751_s12 = smov 0   ;;  %s1753_s13 = smov 0  }
   0x5   :  { %s1755_s14 = smov 0   ;;  %s1757_s15 = smov 0  }
   0x6 LB: > { %s1772_s16 = sadd.s32 4294967295, %s1723_s15   ;;  %s1216_s17 = sadd.s32 4294967294, %s1723_s15   ;;  %s1723_s15 = sphi %s1757_s15, %s2016_s15   ;;  %s1719_s14 = sphi %s1755_s14, %s2015_s14   ;;  %s1715_s13 = sphi %s1753_s13, %s2014_s13   ;;  %s1711_s12 = sphi %s1751_s12, %s2013_s12  }
   0x7   : > { %p40_p0 = scmp.ne.s32.totalorder %s1715_s13, %s1711_s12  ;;  %p41_p1 = scmp.eq.s32.totalorder %s1772_s16, 0 }
   0x8   : > { %p106_p2 = scmp.eq.s32.totalorder %s1772_s16, 1  ;;  %p112_p3 = scmp.eq.s32.totalorder %s1216_s17, 1 }
   0x9   : > { %p1781_p4 = por %p41_p1, %p40_p0  ;;  %p1217_p5 = scmp.ge.s32.totalorder %s1723_s15, 1 }
   0xa   : > { %p1786_p6 = por %p112_p3, %p40_p0  ;;  %p119_p7 = scmp.lt.s32.totalorder %s1723_s15, 3 }
   0xb   : > { %s130_s22 = sshll.u32 %s2004_s1, 4  ;;  %s1725_s24 = smov [#allocation5]   ;;  %s131_s22 = int_to_ptr.hbm [resolvable:$true] %s130_s22 }
   0xc   : > { %p1794_p8 = pnand %p1217_p5, %p119_p7  ;;  %s132_s25 = sshll.u32 %s1725_s24, 4  ;;  %s133_s25 = int_to_ptr.vmem [resolvable:$true] %s132_s25 }
   0xd   : > { %s144_s28 = sshll.u32 %s2005_s2, 4  ;;  %s1726_s29 = smov 64   ;;  %s145_s28 = int_to_ptr.hbm [resolvable:$true] %s144_s28 }
   0xe   : > { %p1504_p9 = pneg %p1794_p8  ;;  %s1727_s30 = smov 4  }
   0xf   : > { %s1728_s4 = smov [#allocation7]   ;;  %s1813_s6 = sadd.s32 1, %s1723_s15  }
  0x10   : > { %p1505_p10 = pnand %p1504_p9, %p41_p1  ;;  %s146_s5 = sshll.u32 %s1728_s4, 4  ;;  %s147_s5 = int_to_ptr.vmem [resolvable:$true] %s146_s5 }
  0x11   : > { %s27_s7 = sadd.s32 1, %s1719_s14  ;;  %s24_s8 = ssub.s32 %s1723_s15, %s1813_s6 }
  0x12   : > { %1507 = dma.hbm_to_vmem [thread:$0]  (!%p1505_p10), %s131_s22, 1024, %s133_s25, [#allocation6], %s1726_s29, %s1726_s29, %s1727_s30  }
  0x13   : > { %1510 = dma.hbm_to_vmem [thread:$0]  (!%p1505_p10), %s145_s28, 1024, %s147_s5, [#allocation6], %s1726_s29, %s1726_s29, %s1727_s30  }
  0x14   : > { %p34_p12 = scmp.ne.s32.totalorder %s1719_s14, %s1715_s13  ;;  %p25_p13 = scmp.eq.s32.totalorder %s24_s8, 0 }
  0x15   : > { %p35_p0 = scmp.eq.s32.totalorder %s1723_s15, 0  ;;  %p1521_p5 = scmp.lt.s32.totalorder %s1723_s15, 2 }
  0x16   : > { %p1823_p3 = por %p106_p2, %p34_p12  ;;  %s160_s11 = sand.u32 1, %s1719_s14  }
  0x17   : > { %s1829_s10 = scalar_select %p25_p13, %s1719_s14, %s27_s7  }
  0x18   : > { %p36_p7 = por %p35_p0, %p34_p12  ;;  %s1221_s17 = sshll.u32 %s160_s11, 8 }
  0x19   : > { %s1426_s20 = sshll.u32 %s1723_s15, 8  ;;  %s164_s25 = scalar_lea.vmem [#allocation2], %s1221_s17 }
  0x1a   : > { %s169_s24 = scalar_lea.hbm %s2003_s0, %s1426_s20  ;;  %s172_s26 = sshll.u32 %s164_s25, 4  ;;  %s173_s26 = int_to_ptr.vmem [resolvable:$true] %s172_s26 }
  0x1b   : > { %s170_s27 = sshll.u32 %s169_s24, 4  ;;  %p1836_p2 = pnand %p1521_p5, %p36_p7  ;;  %s171_s27 = int_to_ptr.hbm [resolvable:$true] %s170_s27 }
  0x1c   : > { %s161_s4 = scalar_lea.sflag [#allocation3], %s160_s11  ;;  %s1623_s5 = sshra.s32 %s171_s27, 4  ;;  %s1624_s5 = int_to_ptr.hbm [resolvable:$true] %s1623_s5 }
  0x1d   : > { %s1625_s7 = scalar_lea.hbm %s1624_s5, 256  ;;  %p1627_p10 = pneg %p1836_p2 }
  0x1e   : > { %p1626_p9 = scmp.ne.s32.totalorder %s1624_s5, %s1625_s7  ;;  %s1630_s20 = scalar_lea.hbm %s2003_s0, 512 }
  0x1f   : > { %p1631_p0 = scmp.lt.s32.totalorder %s1624_s5, %s2003_s0  ;;  %p1632_p5 = scmp.lt.s32.totalorder %s1630_s20, %s1625_s7 }
  0x20   : > { %p1628_p12 = pnand %p1627_p10, %p1626_p9 }
  0x21   : > { %p1633_p7 = por %p1632_p5, %p1631_p0 }
  0x22   : > { %p1629_p13 = pneg %p1628_p12 }
  0x24   : > { %p1634_p11 = pnand %p1633_p7, %p1629_p13 }
  0x26   : > { %1637 = shalt.err (!%p1634_p11)
}
  0x27   : > { %1514 = dma.hbm_to_vmem [thread:$0]  (!%p1836_p2), %s171_s27, 4096, %s173_s26, %s161_s4, %s1726_s29, %s1726_s29, %s1727_s30  }
  0x28   : > { %184 = sbr.rel (%p1794_p8) target bundleno = 609 (0x261), region = 32  ;;  %s1856_s11 = sand.u32 (!%p1794_p8), 1, %s1715_s13  }
  0x29   : > { %s1225_s24 = sshll.u32 (!%p1794_p8), %s1856_s11, 8  ;;  %s187_s25 = scalar_lea.sflag (!%p1794_p8), [#allocation3], %s1856_s11 }
  0x2a   : > { %s1860_s5 = scalar_lea.vmem (!%p1794_p8), [#allocation2], %s1225_s24 }
  0x2d   : > { %1698 = dma.done.wait (%p1781_p4), %s187_s25, 4096  }
  0x2e   : > { %1700 = vsyncadd (%p1781_p4), %s187_s25, 4294963200 }
  0x2f   : > { %1702 = dma.done.wait (%p41_p1), [#allocation6], 2048  }
  0x30   : > { %1704 = vsyncadd (%p41_p1), [#allocation6], 4294965248  ;;  %v1466_v0 = vld [vmem:[#allocation5 + $0x38] sm:$0xff]  ;;  %v1465_v1 = vld [vmem:[#allocation5 + $0x30] sm:$0xff]  ;;  %s1228_s18 = sshll.u32 %s1856_s11, 9  ;;  %s1475_s29 = sshll.u32 %s1772_s16, 9 }
  0x31   : > { %546 = vmatpush.bf16.msra.mxu0 %v1466_v0  ;;  %1476 = vmatpush.bf16.msra.mxu2 %v1466_v0  ;;  %v1464_v2 = vld [vmem:[#allocation5 + $0x28] sm:$0xff]  ;;  %v1463_v3 = vld [vmem:[#allocation5 + $0x20] sm:$0xff]  ;;  %v1462_v4 = vld [vmem:[#allocation5 + $0x18] sm:$0xff]  ;;  %s1903_s23 = scalar_lea.vmem [#allocation8], %s1228_s18  ;;  %s1120_s27 = scalar_lea.hbm %s2006_s3, %s1475_s29 }
  0x32   : > { %v1461_v5 = vld [vmem:[#allocation5 + $0x10] sm:$0xff]  ;;  %v1460_v6 = vld [vmem:[#allocation5 + $0x8] sm:$0xff]  ;;  %v1459_v7 = vld [vmem:[#allocation5] sm:$0xff]  ;;  %s1121_s28 = sshll.u32 %s1903_s23, 4  ;;  %s1123_s4 = sshll.u32 %s1120_s27, 4  ;;  %s1122_s28 = int_to_ptr.vmem [resolvable:$true] %s1121_s28  ;;  %s1124_s4 = int_to_ptr.hbm [resolvable:$true] %s1123_s4 }
  0x33   : > { %v1427_v8 = vld [vmem:[%s1860_s5] sm:$0xff]  ;;  %v1428_v10 = vld [vmem:[%s1860_s5 + $0x8] sm:$0xff]  ;;  %v1429_v12 = vld [vmem:[%s1860_s5 + $0x10] sm:$0xff]  ;;  %s1109_s7 = scalar_lea.sflag [#allocation4], %s1856_s11  ;;  %s1667_s8 = sshra.s32 %s1124_s4, 4  ;;  %s1668_s8 = int_to_ptr.hbm [resolvable:$true] %s1667_s8 }
  0x34   : > { %v1443_v9 = vld [vmem:[%s1860_s5 + $0x80] sm:$0xff]  ;;  %v1444_v11 = vld [vmem:[%s1860_s5 + $0x88] sm:$0xff]  ;;  %v1445_v13 = vld [vmem:[%s1860_s5 + $0x90] sm:$0xff]  ;;  %s1669_s17 = scalar_lea.hbm %s1668_s8, 512  ;;  %s1673_s21 = scalar_lea.hbm %s2006_s3, 1024 }
  0x35   : > { %547 = vmatpush.bf16.msra.mxu0 %v1465_v1  ;;  %1477 = vmatpush.bf16.msra.mxu2 %v1465_v1  ;;  %v1430_v14 = vld [vmem:[%s1860_s5 + $0x18] sm:$0xff]  ;;  %v1431_v16 = vld [vmem:[%s1860_s5 + $0x20] sm:$0xff]  ;;  %v1473_v19 = vld [vmem:[#allocation7 + $0x30] sm:$0xff]  ;;  %p1670_p1 = scmp.ne.s32.totalorder %s1668_s8, %s1669_s17  ;;  %p1674_p11 = scmp.lt.s32.totalorder %s1668_s8, %s2006_s3 }
  0x36   : > { %v1446_v15 = vld [vmem:[%s1860_s5 + $0x98] sm:$0xff]  ;;  %v1447_v17 = vld [vmem:[%s1860_s5 + $0xa0] sm:$0xff]  ;;  %v1432_v20 = vld [vmem:[%s1860_s5 + $0x28] sm:$0xff]  ;;  %p1675_p2 = scmp.lt.s32.totalorder %s1673_s21, %s1669_s17 }
  0x37   : > { %v1474_v18 = vld [vmem:[#allocation7 + $0x38] sm:$0xff]  ;;  %v1448_v21 = vld [vmem:[%s1860_s5 + $0xa8] sm:$0xff]  ;;  %v1471_v23 = vld [vmem:[#allocation7 + $0x20] sm:$0xff]  ;;  %p1671_p4 = pnand %p1670_p1, %p1823_p3 }
  0x38   : > { %875 = vmatpush.bf16.msra.mxu1 %v1474_v18  ;;  %1484 = vmatpush.bf16.msra.mxu3 %v1474_v18  ;;  %v1472_v22 = vld [vmem:[#allocation7 + $0x28] sm:$0xff]  ;;  %v1470_v24 = vld [vmem:[#allocation7 + $0x18] sm:$0xff]  ;;  %v1433_v25 = vld [vmem:[%s1860_s5 + $0x30] sm:$0xff]  ;;  %p1676_p9 = por %p1675_p2, %p1674_p11 }
  0x39   : > { %548 = vmatpush.bf16.msra.mxu0 %v1464_v2  ;;  %1478 = vmatpush.bf16.msra.mxu2 %v1464_v2  ;;  %v1449_v26 = vld [vmem:[%s1860_s5 + $0xb0] sm:$0xff]  ;;  %v1468_v28 = vld [vmem:[#allocation7 + $0x8] sm:$0xff]  ;;  %v1467_v29 = vld [vmem:[#allocation7] sm:$0xff]  ;;  %p1672_p8 = pneg %p1671_p4 }
  0x3a   : > { %v1469_v27 = vld [vmem:[#allocation7 + $0x10] sm:$0xff]  ;;  %v1434_v30 = vld [vmem:[%s1860_s5 + $0x38] sm:$0xff]  ;;  %v1435_v32 = vld [vmem:[%s1860_s5 + $0x40] sm:$0xff] }
  0x3b   : > { %v1450_v31 = vld [vmem:[%s1860_s5 + $0xb8] sm:$0xff]  ;;  %v1451_v33 = vld [vmem:[%s1860_s5 + $0xc0] sm:$0xff]  ;;  %v1436_v43 = vld [vmem:[%s1860_s5 + $0x48] sm:$0xff]  ;;  %p1677_p10 = pnand %p1676_p9, %p1672_p8 }
  0x3c   : > { %876 = vmatpush.bf16.msra.mxu1 %v1473_v19  ;;  %1485 = vmatpush.bf16.msra.mxu3 %v1473_v19  ;;  %v1452_v44 = vld [vmem:[%s1860_s5 + $0xc8] sm:$0xff]  ;;  %v1437_v55 = vld [vmem:[%s1860_s5 + $0x50] sm:$0xff] }
  0x3d   : > { %549 = vmatpush.bf16.msra.mxu0 %v1463_v3  ;;  %1479 = vmatpush.bf16.msra.mxu2 %v1463_v3  ;;  %v1453_v56 = vld [vmem:[%s1860_s5 + $0xd0] sm:$0xff]  ;;  %v1438_v3 = vld [vmem:[%s1860_s5 + $0x58] sm:$0xff] }
  0x40   : > { %877 = vmatpush.bf16.msra.mxu1 %v1472_v22  ;;  %1486 = vmatpush.bf16.msra.mxu3 %v1472_v22 }
  0x41   : > { %550 = vmatpush.bf16.msra.mxu0 %v1462_v4  ;;  %1480 = vmatpush.bf16.msra.mxu2 %v1462_v4  ;;  %v1454_v4 = vld [vmem:[%s1860_s5 + $0xd8] sm:$0xff] }
  0x44   : > { %878 = vmatpush.bf16.msra.mxu1 %v1471_v23  ;;  %1487 = vmatpush.bf16.msra.mxu3 %v1471_v23 }
  0x45   : > { %551 = vmatpush.bf16.msra.mxu0 %v1461_v5  ;;  %1481 = vmatpush.bf16.msra.mxu2 %v1461_v5 }
  0x48   : > { %879 = vmatpush.bf16.msra.mxu1 %v1470_v24  ;;  %1488 = vmatpush.bf16.msra.mxu3 %v1470_v24 }
  0x49   : > { %552 = vmatpush.bf16.msra.mxu0 %v1460_v6  ;;  %1482 = vmatpush.bf16.msra.mxu2 %v1460_v6 }
  0x4c   : > { %880 = vmatpush.bf16.msra.mxu1 %v1469_v27  ;;  %1489 = vmatpush.bf16.msra.mxu3 %v1469_v27  ;;  %v1440_v27 = vld [vmem:[%s1860_s5 + $0x68] sm:$0xff] }
  0x4d   : > { %553 = vmatpush.bf16.msra.mxu0 %v1459_v7  ;;  %1483 = vmatpush.bf16.msra.mxu2 %v1459_v7 }
  0x50   : > { %554 = vmatmul.bf16.vlgmr.msra.gmra.mxu0 %v1427_v8  ;;  %634 = vmatmul.bf16.vlgmr.msra.gmra.mxu2 %v1443_v9 }
  0x51   : > { %881 = vmatpush.bf16.msra.mxu1 %v1468_v28  ;;  %1490 = vmatpush.bf16.msra.mxu3 %v1468_v28  ;;  %v1456_v28 = vld [vmem:[%s1860_s5 + $0xe8] sm:$0xff] }
  0x55   : > { %882 = vmatpush.bf16.msra.mxu1 %v1467_v29  ;;  %1491 = vmatpush.bf16.msra.mxu3 %v1467_v29 }
  0x60   : > { %559 = vmatmul.bf16.gmra.mxu0 %v1428_v10  ;;  %639 = vmatmul.bf16.gmra.mxu2 %v1444_v11 }
  0x70   : > { %564 = vmatmul.bf16.gmra.mxu0 %v1429_v12  ;;  %644 = vmatmul.bf16.gmra.mxu2 %v1445_v13 }
  0x80   : > { %569 = vmatmul.bf16.gmra.mxu0 %v1430_v14  ;;  %649 = vmatmul.bf16.gmra.mxu2 %v1446_v15  ;;  %v1439_v15 = vld [vmem:[%s1860_s5 + $0x60] sm:$0xff] }
  0x90   : > { %574 = vmatmul.bf16.gmra.mxu0 %v1431_v16  ;;  %654 = vmatmul.bf16.gmra.mxu2 %v1447_v17  ;;  %v1455_v16 = vld [vmem:[%s1860_s5 + $0xe0] sm:$0xff] }
  0xa0   : > { %579 = vmatmul.bf16.gmra.mxu0 %v1432_v20  ;;  %659 = vmatmul.bf16.gmra.mxu2 %v1448_v21 }
  0xb0   : > { %584 = vmatmul.bf16.gmra.mxu0 %v1433_v25  ;;  %664 = vmatmul.bf16.gmra.mxu2 %v1449_v26 }
  0xc0   : > { %589 = vmatmul.bf16.gmra.mxu0 %v1434_v30  ;;  %669 = vmatmul.bf16.gmra.mxu2 %v1450_v31 }
  0xcd   : > { %v555_v34 = vpop.f32.mrf.mxu0 }
  0xce   : > { %v715_v36 = vmax.f32 %v555_v34, 0.0 }
  0xd0   : > { %594 = vmatmul.bf16.gmra.mxu0 %v1435_v32  ;;  %674 = vmatmul.bf16.gmra.mxu2 %v1451_v33 }
  0xd3   : > { %v635_v35 = vpop.f32.mrf.mxu2 }
  0xd4   : > { %v747_v41 = vmax.f32 %v635_v35, 0.0 }
  0xd5   : > { %v557_v37 = vpop.f32.mrf.mxu0 }
  0xd6   : > { %v716_v38 = vmax.f32 %v557_v37, 0.0 }
  0xd8   : > { %v779_v39 = vpack.c.bf16 %v716_v38, %v715_v36 }
  0xda   : > { %883 = vmatmul.bf16.vlgmr.msra.gmra.mxu1 %v779_v39  ;;  %v1441_v39 = vld [vmem:[%s1860_s5 + $0x70] sm:$0xff] }
  0xdb   : > { %v637_v40 = vpop.f32.mrf.mxu2 }
  0xdc   : > { %v748_v42 = vmax.f32 %v637_v40, 0.0  ;;  %v1457_v40 = vld [vmem:[%s1860_s5 + $0xf0] sm:$0xff] }
  0xdd   : > { %v560_v45 = vpop.f32.mrf.mxu0 }
  0xde   : > { %v795_v46 = vpack.c.bf16 %v748_v42, %v747_v41  ;;  %v717_v48 = vmax.f32 %v560_v45, 0.0 }
  0xe0   : > { %599 = vmatmul.bf16.gmra.mxu0 %v1436_v43  ;;  %679 = vmatmul.bf16.gmra.mxu2 %v1452_v44 }
  0xe1   : > { %963 = vmatmul.bf16.vlgmr.msra.gmra.mxu3 %v795_v46 }
  0xe3   : > { %v640_v47 = vpop.f32.mrf.mxu2 }
  0xe4   : > { %v749_v53 = vmax.f32 %v640_v47, 0.0 }
  0xe5   : > { %v562_v49 = vpop.f32.mrf.mxu0 }
  0xe6   : > { %v718_v50 = vmax.f32 %v562_v49, 0.0 }
  0xe8   : > { %v780_v51 = vpack.c.bf16 %v718_v50, %v717_v48 }
  0xea   : > { %888 = vmatmul.bf16.gmra.mxu1 %v780_v51  ;;  %v1442_v51 = vld [vmem:[%s1860_s5 + $0x78] sm:$0xff] }
  0xeb   : > { %v642_v52 = vpop.f32.mrf.mxu2 }
  0xec   : > { %v750_v54 = vmax.f32 %v642_v52, 0.0  ;;  %v1458_v52 = vld [vmem:[%s1860_s5 + $0xf8] sm:$0xff] }
  0xed   : > { %v565_v57 = vpop.f32.mrf.mxu0 }
  0xee   : > { %v796_v58 = vpack.c.bf16 %v750_v54, %v749_v53  ;;  %v719_v60 = vmax.f32 %v565_v57, 0.0 }
  0xf0   : > { %604 = vmatmul.bf16.gmra.mxu0 %v1437_v55  ;;  %684 = vmatmul.bf16.gmra.mxu2 %v1453_v56 }
  0xf1   : > { %968 = vmatmul.bf16.gmra.mxu3 %v796_v58 }
  0xf3   : > { %v645_v59 = vpop.f32.mrf.mxu2 }
  0xf4   : > { %v751_v1 = vmax.f32 %v645_v59, 0.0 }
  0xf5   : > { %v567_v61 = vpop.f32.mrf.mxu0 }
  0xf6   : > { %v720_v62 = vmax.f32 %v567_v61, 0.0 }
  0xf8   : > { %v781_v63 = vpack.c.bf16 %v720_v62, %v719_v60 }
  0xfa   : > { %893 = vmatmul.bf16.gmra.mxu1 %v781_v63 }
  0xfb   : > { %v647_v0 = vpop.f32.mrf.mxu2 }
  0xfc   : > { %v752_v2 = vmax.f32 %v647_v0, 0.0 }
  0xfd   : > { %v570_v5 = vpop.f32.mrf.mxu0 }
  0xfe   : > { %v797_v6 = vpack.c.bf16 %v752_v2, %v751_v1  ;;  %v721_v8 = vmax.f32 %v570_v5, 0.0 }
 0x100   : > { %609 = vmatmul.bf16.gmra.mxu0 %v1438_v3  ;;  %689 = vmatmul.bf16.gmra.mxu2 %v1454_v4 }
 0x101   : > { %973 = vmatmul.bf16.gmra.mxu3 %v797_v6 }
 0x103   : > { %v650_v7 = vpop.f32.mrf.mxu2 }
 0x104   : > { %v753_v13 = vmax.f32 %v650_v7, 0.0 }
 0x105   : > { %v572_v9 = vpop.f32.mrf.mxu0 }
 0x106   : > { %v722_v10 = vmax.f32 %v572_v9, 0.0 }
 0x108   : > { %v782_v11 = vpack.c.bf16 %v722_v10, %v721_v8 }
 0x10a   : > { %898 = vmatmul.bf16.gmra.mxu1 %v782_v11 }
 0x10b   : > { %v652_v12 = vpop.f32.mrf.mxu2 }
 0x10c   : > { %v754_v14 = vmax.f32 %v652_v12, 0.0 }
 0x10d   : > { %v575_v17 = vpop.f32.mrf.mxu0 }
 0x10e   : > { %v798_v18 = vpack.c.bf16 %v754_v14, %v753_v13  ;;  %v723_v20 = vmax.f32 %v575_v17, 0.0 }
 0x110   : > { %614 = vmatmul.bf16.gmra.mxu0 %v1439_v15  ;;  %694 = vmatmul.bf16.gmra.mxu2 %v1455_v16 }
 0x111   : > { %978 = vmatmul.bf16.gmra.mxu3 %v798_v18 }
 0x113   : > { %v655_v19 = vpop.f32.mrf.mxu2 }
 0x114   : > { %v755_v25 = vmax.f32 %v655_v19, 0.0 }
 0x115   : > { %v577_v21 = vpop.f32.mrf.mxu0 }
 0x116   : > { %v724_v22 = vmax.f32 %v577_v21, 0.0 }
 0x118   : > { %v783_v23 = vpack.c.bf16 %v724_v22, %v723_v20 }
 0x11a   : > { %903 = vmatmul.bf16.gmra.mxu1 %v783_v23 }
 0x11b   : > { %v657_v24 = vpop.f32.mrf.mxu2 }
 0x11c   : > { %v756_v26 = vmax.f32 %v657_v24, 0.0 }
 0x11d   : > { %v580_v29 = vpop.f32.mrf.mxu0 }
 0x11e   : > { %v799_v30 = vpack.c.bf16 %v756_v26, %v755_v25  ;;  %v725_v32 = vmax.f32 %v580_v29, 0.0 }
 0x120   : > { %619 = vmatmul.bf16.gmra.mxu0 %v1440_v27  ;;  %699 = vmatmul.bf16.gmra.mxu2 %v1456_v28 }
 0x121   : > { %983 = vmatmul.bf16.gmra.mxu3 %v799_v30 }
 0x123   : > { %v660_v31 = vpop.f32.mrf.mxu2 }
 0x124   : > { %v757_v37 = vmax.f32 %v660_v31, 0.0 }
 0x125   : > { %v582_v33 = vpop.f32.mrf.mxu0 }
 0x126   : > { %v726_v34 = vmax.f32 %v582_v33, 0.0 }
 0x128   : > { %v784_v35 = vpack.c.bf16 %v726_v34, %v725_v32 }
 0x12a   : > { %908 = vmatmul.bf16.gmra.mxu1 %v784_v35 }
 0x12b   : > { %v662_v36 = vpop.f32.mrf.mxu2 }
 0x12c   : > { %v758_v38 = vmax.f32 %v662_v36, 0.0 }
 0x12d   : > { %v585_v41 = vpop.f32.mrf.mxu0 }
 0x12e   : > { %v800_v42 = vpack.c.bf16 %v758_v38, %v757_v37  ;;  %v727_v44 = vmax.f32 %v585_v41, 0.0 }
 0x130   : > { %624 = vmatmul.bf16.gmra.mxu0 %v1441_v39  ;;  %704 = vmatmul.bf16.gmra.mxu2 %v1457_v40 }
 0x131   : > { %988 = vmatmul.bf16.gmra.mxu3 %v800_v42 }
 0x133   : > { %v665_v43 = vpop.f32.mrf.mxu2 }
 0x134   : > { %v759_v49 = vmax.f32 %v665_v43, 0.0 }
 0x135   : > { %v587_v45 = vpop.f32.mrf.mxu0 }
 0x136   : > { %v728_v46 = vmax.f32 %v587_v45, 0.0 }
 0x138   : > { %v785_v47 = vpack.c.bf16 %v728_v46, %v727_v44 }
 0x13a   : > { %913 = vmatmul.bf16.gmra.mxu1 %v785_v47 }
 0x13b   : > { %v667_v48 = vpop.f32.mrf.mxu2 }
 0x13c   : > { %v760_v50 = vmax.f32 %v667_v48, 0.0 }
 0x13d   : > { %v590_v53 = vpop.f32.mrf.mxu0 }
 0x13e   : > { %v801_v54 = vpack.c.bf16 %v760_v50, %v759_v49  ;;  %v729_v56 = vmax.f32 %v590_v53, 0.0 }
 0x140   : > { %629 = vmatmul.bf16.gmra.mxu0 %v1442_v51  ;;  %709 = vmatmul.bf16.gmra.mxu2 %v1458_v52 }
 0x141   : > { %993 = vmatmul.bf16.gmra.mxu3 %v801_v54 }
 0x143   : > { %v670_v55 = vpop.f32.mrf.mxu2 }
 0x144   : > { %v761_v61 = vmax.f32 %v670_v55, 0.0 }
 0x145   : > { %v592_v57 = vpop.f32.mrf.mxu0 }
 0x146   : > { %v730_v58 = vmax.f32 %v592_v57, 0.0 }
 0x148   : > { %v786_v59 = vpack.c.bf16 %v730_v58, %v729_v56 }
 0x14a   : > { %918 = vmatmul.bf16.gmra.mxu1 %v786_v59 }
 0x14b   : > { %v672_v60 = vpop.f32.mrf.mxu2 }
 0x14c   : > { %v762_v62 = vmax.f32 %v672_v60, 0.0 }
 0x14d   : > { %v595_v63 = vpop.f32.mrf.mxu0 }
 0x14e   : > { %v802_v0 = vpack.c.bf16 %v762_v62, %v761_v61  ;;  %v731_v2 = vmax.f32 %v595_v63, 0.0 }
 0x151   : > { %998 = vmatmul.bf16.gmra.mxu3 %v802_v0 }
 0x153   : > { %v675_v1 = vpop.f32.mrf.mxu2 }
 0x154   : > { %v763_v8 = vmax.f32 %v675_v1, 0.0 }
 0x155   : > { %v597_v3 = vpop.f32.mrf.mxu0 }
 0x156   : > { %v732_v4 = vmax.f32 %v597_v3, 0.0 }
 0x157   : > { %v884_v5 = vpop.f32.mrf.mxu1 }
 0x158   : > { %1044 = vst [vmem:[%s1903_s23] sm:$0xff] %v884_v5  ;;  %v787_v6 = vpack.c.bf16 %v732_v4, %v731_v2 }
 0x15a   : > { %923 = vmatmul.bf16.gmra.mxu1 %v787_v6 }
 0x15b   : > { %v677_v7 = vpop.f32.mrf.mxu2 }
 0x15c   : > { %v764_v9 = vmax.f32 %v677_v7, 0.0 }
 0x15d   : > { %v600_v10 = vpop.f32.mrf.mxu0 }
 0x15e   : > { %v803_v11 = vpack.c.bf16 %v764_v9, %v763_v8  ;;  %v733_v14 = vmax.f32 %v600_v10, 0.0 }
 0x15f   : > { %v886_v12 = vpop.f32.mrf.mxu1 }
 0x160   : > { %1045 = vst [vmem:[%s1903_s23 + $0x8] sm:$0xff] %v886_v12 }
 0x161   : > { %1003 = vmatmul.bf16.gmra.mxu3 %v803_v11 }
 0x163   : > { %v680_v13 = vpop.f32.mrf.mxu2 }
 0x164   : > { %v964_v15 = vpop.f32.mrf.mxu3  ;;  %v765_v21 = vmax.f32 %v680_v13, 0.0 }
 0x165   : > { %1076 = vst [vmem:[%s1903_s23 + $0x100] sm:$0xff] %v964_v15  ;;  %v602_v16 = vpop.f32.mrf.mxu0 }
 0x166   : > { %v734_v17 = vmax.f32 %v602_v16, 0.0 }
 0x167   : > { %v889_v18 = vpop.f32.mrf.mxu1 }
 0x168   : > { %1046 = vst [vmem:[%s1903_s23 + $0x10] sm:$0xff] %v889_v18  ;;  %v788_v19 = vpack.c.bf16 %v734_v17, %v733_v14 }
 0x16a   : > { %928 = vmatmul.bf16.gmra.mxu1 %v788_v19 }
 0x16b   : > { %v682_v20 = vpop.f32.mrf.mxu2 }
 0x16c   : > { %v766_v22 = vmax.f32 %v682_v20, 0.0  ;;  %v966_v23 = vpop.f32.mrf.mxu3 }
 0x16d   : > { %1077 = vst [vmem:[%s1903_s23 + $0x108] sm:$0xff] %v966_v23  ;;  %v605_v24 = vpop.f32.mrf.mxu0 }
 0x16e   : > { %v804_v25 = vpack.c.bf16 %v766_v22, %v765_v21  ;;  %v735_v28 = vmax.f32 %v605_v24, 0.0 }
 0x16f   : > { %v891_v26 = vpop.f32.mrf.mxu1 }
 0x170   : > { %1047 = vst [vmem:[%s1903_s23 + $0x18] sm:$0xff] %v891_v26 }
 0x171   : > { %1008 = vmatmul.bf16.gmra.mxu3 %v804_v25 }
 0x173   : > { %v685_v27 = vpop.f32.mrf.mxu2 }
 0x174   : > { %v969_v29 = vpop.f32.mrf.mxu3  ;;  %v767_v35 = vmax.f32 %v685_v27, 0.0 }
 0x175   : > { %1078 = vst [vmem:[%s1903_s23 + $0x110] sm:$0xff] %v969_v29  ;;  %v607_v30 = vpop.f32.mrf.mxu0 }
 0x176   : > { %v736_v31 = vmax.f32 %v607_v30, 0.0 }
 0x177   : > { %v894_v32 = vpop.f32.mrf.mxu1 }
 0x178   : > { %1048 = vst [vmem:[%s1903_s23 + $0x20] sm:$0xff] %v894_v32  ;;  %v789_v33 = vpack.c.bf16 %v736_v31, %v735_v28 }
 0x17a   : > { %933 = vmatmul.bf16.gmra.mxu1 %v789_v33 }
 0x17b   : > { %v687_v34 = vpop.f32.mrf.mxu2 }
 0x17c   : > { %v768_v36 = vmax.f32 %v687_v34, 0.0  ;;  %v971_v37 = vpop.f32.mrf.mxu3 }
 0x17d   : > { %1079 = vst [vmem:[%s1903_s23 + $0x118] sm:$0xff] %v971_v37  ;;  %v610_v38 = vpop.f32.mrf.mxu0 }
 0x17e   : > { %v805_v39 = vpack.c.bf16 %v768_v36, %v767_v35  ;;  %v737_v42 = vmax.f32 %v610_v38, 0.0 }
 0x17f   : > { %v896_v40 = vpop.f32.mrf.mxu1 }
 0x180   : > { %1049 = vst [vmem:[%s1903_s23 + $0x28] sm:$0xff] %v896_v40 }
 0x181   : > { %1013 = vmatmul.bf16.gmra.mxu3 %v805_v39 }
 0x183   : > { %v690_v41 = vpop.f32.mrf.mxu2 }
 0x184   : > { %v974_v43 = vpop.f32.mrf.mxu3  ;;  %v769_v49 = vmax.f32 %v690_v41, 0.0 }
 0x185   : > { %1080 = vst [vmem:[%s1903_s23 + $0x120] sm:$0xff] %v974_v43  ;;  %v612_v44 = vpop.f32.mrf.mxu0 }
 0x186   : > { %v738_v45 = vmax.f32 %v612_v44, 0.0 }
 0x187   : > { %v899_v46 = vpop.f32.mrf.mxu1 }
 0x188   : > { %1050 = vst [vmem:[%s1903_s23 + $0x30] sm:$0xff] %v899_v46  ;;  %v790_v47 = vpack.c.bf16 %v738_v45, %v737_v42 }
 0x18a   : > { %938 = vmatmul.bf16.gmra.mxu1 %v790_v47 }
 0x18b   : > { %v692_v48 = vpop.f32.mrf.mxu2 }
 0x18c   : > { %v770_v50 = vmax.f32 %v692_v48, 0.0  ;;  %v976_v51 = vpop.f32.mrf.mxu3 }
 0x18d   : > { %1081 = vst [vmem:[%s1903_s23 + $0x128] sm:$0xff] %v976_v51  ;;  %v615_v52 = vpop.f32.mrf.mxu0 }
 0x18e   : > { %v806_v53 = vpack.c.bf16 %v770_v50, %v769_v49  ;;  %v739_v56 = vmax.f32 %v615_v52, 0.0 }
 0x18f   : > { %v901_v54 = vpop.f32.mrf.mxu1 }
 0x190   : > { %1051 = vst [vmem:[%s1903_s23 + $0x38] sm:$0xff] %v901_v54 }
 0x191   : > { %1018 = vmatmul.bf16.gmra.mxu3 %v806_v53 }
 0x193   : > { %v695_v55 = vpop.f32.mrf.mxu2 }
 0x194   : > { %v979_v57 = vpop.f32.mrf.mxu3  ;;  %v771_v63 = vmax.f32 %v695_v55, 0.0 }
 0x195   : > { %1082 = vst [vmem:[%s1903_s23 + $0x130] sm:$0xff] %v979_v57  ;;  %v617_v58 = vpop.f32.mrf.mxu0 }
 0x196   : > { %v740_v59 = vmax.f32 %v617_v58, 0.0 }
 0x197   : > { %v904_v60 = vpop.f32.mrf.mxu1 }
 0x198   : > { %v791_v61 = vpack.c.bf16 %v740_v59, %v739_v56  ;;  %1052 = vst [vmem:[%s1903_s23 + $0x40] sm:$0xff] %v904_v60 }
 0x19a   : > { %943 = vmatmul.bf16.gmra.mxu1 %v791_v61 }
 0x19b   : > { %v697_v62 = vpop.f32.mrf.mxu2 }
 0x19c   : > { %v772_v0 = vmax.f32 %v697_v62, 0.0  ;;  %v981_v1 = vpop.f32.mrf.mxu3 }
 0x19d   : > { %1083 = vst [vmem:[%s1903_s23 + $0x138] sm:$0xff] %v981_v1  ;;  %v620_v2 = vpop.f32.mrf.mxu0 }
 0x19e   : > { %v807_v3 = vpack.c.bf16 %v772_v0, %v771_v63  ;;  %v741_v6 = vmax.f32 %v620_v2, 0.0 }
 0x19f   : > { %v906_v4 = vpop.f32.mrf.mxu1 }
 0x1a0   : > { %1053 = vst [vmem:[%s1903_s23 + $0x48] sm:$0xff] %v906_v4 }
 0x1a1   : > { %1023 = vmatmul.bf16.gmra.mxu3 %v807_v3 }
 0x1a3   : > { %v700_v5 = vpop.f32.mrf.mxu2 }
 0x1a4   : > { %v984_v7 = vpop.f32.mrf.mxu3  ;;  %v773_v13 = vmax.f32 %v700_v5, 0.0 }
 0x1a5   : > { %1084 = vst [vmem:[%s1903_s23 + $0x140] sm:$0xff] %v984_v7  ;;  %v622_v8 = vpop.f32.mrf.mxu0 }
 0x1a6   : > { %v742_v9 = vmax.f32 %v622_v8, 0.0 }
 0x1a7   : > { %v909_v10 = vpop.f32.mrf.mxu1 }
 0x1a8   : > { %v792_v11 = vpack.c.bf16 %v742_v9, %v741_v6  ;;  %1054 = vst [vmem:[%s1903_s23 + $0x50] sm:$0xff] %v909_v10 }
 0x1aa   : > { %948 = vmatmul.bf16.gmra.mxu1 %v792_v11 }
 0x1ab   : > { %v702_v12 = vpop.f32.mrf.mxu2 }
 0x1ac   : > { %v774_v14 = vmax.f32 %v702_v12, 0.0  ;;  %v986_v15 = vpop.f32.mrf.mxu3 }
 0x1ad   : > { %1085 = vst [vmem:[%s1903_s23 + $0x148] sm:$0xff] %v986_v15  ;;  %v625_v16 = vpop.f32.mrf.mxu0 }
 0x1ae   : > { %v808_v17 = vpack.c.bf16 %v774_v14, %v773_v13  ;;  %v743_v20 = vmax.f32 %v625_v16, 0.0 }
 0x1af   : > { %v911_v18 = vpop.f32.mrf.mxu1 }
 0x1b0   : > { %1055 = vst [vmem:[%s1903_s23 + $0x58] sm:$0xff] %v911_v18 }
 0x1b1   : > { %1028 = vmatmul.bf16.gmra.mxu3 %v808_v17 }
 0x1b3   : > { %v705_v19 = vpop.f32.mrf.mxu2 }
 0x1b4   : > { %v989_v21 = vpop.f32.mrf.mxu3  ;;  %v775_v27 = vmax.f32 %v705_v19, 0.0 }
 0x1b5   : > { %1086 = vst [vmem:[%s1903_s23 + $0x150] sm:$0xff] %v989_v21  ;;  %v627_v22 = vpop.f32.mrf.mxu0 }
 0x1b6   : > { %v744_v23 = vmax.f32 %v627_v22, 0.0 }
 0x1b7   : > { %v914_v24 = vpop.f32.mrf.mxu1 }
 0x1b8   : > { %v793_v25 = vpack.c.bf16 %v744_v23, %v743_v20  ;;  %1056 = vst [vmem:[%s1903_s23 + $0x60] sm:$0xff] %v914_v24 }
 0x1ba   : > { %953 = vmatmul.bf16.gmra.mxu1 %v793_v25 }
 0x1bb   : > { %v707_v26 = vpop.f32.mrf.mxu2 }
 0x1bc   : > { %v776_v28 = vmax.f32 %v707_v26, 0.0  ;;  %v991_v29 = vpop.f32.mrf.mxu3 }
 0x1bd   : > { %1087 = vst [vmem:[%s1903_s23 + $0x158] sm:$0xff] %v991_v29  ;;  %v630_v30 = vpop.f32.mrf.mxu0 }
 0x1be   : > { %v809_v31 = vpack.c.bf16 %v776_v28, %v775_v27  ;;  %v745_v34 = vmax.f32 %v630_v30, 0.0 }
 0x1bf   : > { %v916_v32 = vpop.f32.mrf.mxu1 }
 0x1c0   : > { %1057 = vst [vmem:[%s1903_s23 + $0x68] sm:$0xff] %v916_v32 }
 0x1c1   : > { %1033 = vmatmul.bf16.gmra.mxu3 %v809_v31 }
 0x1c3   : > { %v710_v33 = vpop.f32.mrf.mxu2 }
 0x1c4   : > { %v994_v35 = vpop.f32.mrf.mxu3  ;;  %v777_v41 = vmax.f32 %v710_v33, 0.0 }
 0x1c5   : > { %1088 = vst [vmem:[%s1903_s23 + $0x160] sm:$0xff] %v994_v35  ;;  %v632_v36 = vpop.f32.mrf.mxu0 }
 0x1c6   : > { %v746_v37 = vmax.f32 %v632_v36, 0.0 }
 0x1c7   : > { %v919_v38 = vpop.f32.mrf.mxu1 }
 0x1c8   : > { %v794_v39 = vpack.c.bf16 %v746_v37, %v745_v34  ;;  %1058 = vst [vmem:[%s1903_s23 + $0x70] sm:$0xff] %v919_v38 }
 0x1ca   : > { %958 = vmatmul.bf16.gmra.mxu1 %v794_v39 }
 0x1cb   : > { %v712_v40 = vpop.f32.mrf.mxu2 }
 0x1cc   : > { %v778_v42 = vmax.f32 %v712_v40, 0.0  ;;  %v996_v43 = vpop.f32.mrf.mxu3 }
 0x1cd   : > { %1089 = vst [vmem:[%s1903_s23 + $0x168] sm:$0xff] %v996_v43 }
 0x1ce   : > { %v810_v44 = vpack.c.bf16 %v778_v42, %v777_v41 }
 0x1cf   : > { %v921_v45 = vpop.f32.mrf.mxu1 }
 0x1d0   : > { %1059 = vst [vmem:[%s1903_s23 + $0x78] sm:$0xff] %v921_v45 }
 0x1d1   : > { %1038 = vmatmul.bf16.gmra.mxu3 %v810_v44 }
 0x1d4   : > { %v999_v46 = vpop.f32.mrf.mxu3 }
 0x1d5   : > { %1090 = vst [vmem:[%s1903_s23 + $0x170] sm:$0xff] %v999_v46 }
 0x1d7   : > { %v924_v47 = vpop.f32.mrf.mxu1 }
 0x1d8   : > { %1060 = vst [vmem:[%s1903_s23 + $0x80] sm:$0xff] %v924_v47 }
 0x1dc   : > { %v1001_v48 = vpop.f32.mrf.mxu3 }
 0x1dd   : > { %1091 = vst [vmem:[%s1903_s23 + $0x178] sm:$0xff] %v1001_v48 }
 0x1df   : > { %v926_v49 = vpop.f32.mrf.mxu1 }
 0x1e0   : > { %1061 = vst [vmem:[%s1903_s23 + $0x88] sm:$0xff] %v926_v49 }
 0x1e4   : > { %v1004_v50 = vpop.f32.mrf.mxu3 }
 0x1e5   : > { %1092 = vst [vmem:[%s1903_s23 + $0x180] sm:$0xff] %v1004_v50 }
 0x1e7   : > { %v929_v51 = vpop.f32.mrf.mxu1 }
 0x1e8   : > { %1062 = vst [vmem:[%s1903_s23 + $0x90] sm:$0xff] %v929_v51 }
 0x1ec   : > { %v1006_v52 = vpop.f32.mrf.mxu3 }
 0x1ed   : > { %1093 = vst [vmem:[%s1903_s23 + $0x188] sm:$0xff] %v1006_v52 }
 0x1ef   : > { %v931_v53 = vpop.f32.mrf.mxu1 }
 0x1f0   : > { %1063 = vst [vmem:[%s1903_s23 + $0x98] sm:$0xff] %v931_v53 }
 0x1f4   : > { %v1009_v54 = vpop.f32.mrf.mxu3 }
 0x1f5   : > { %1094 = vst [vmem:[%s1903_s23 + $0x190] sm:$0xff] %v1009_v54 }
 0x1f7   : > { %v934_v55 = vpop.f32.mrf.mxu1 }
 0x1f8   : > { %1064 = vst [vmem:[%s1903_s23 + $0xa0] sm:$0xff] %v934_v55 }
 0x1fc   : > { %v1011_v56 = vpop.f32.mrf.mxu3 }
 0x1fd   : > { %1095 = vst [vmem:[%s1903_s23 + $0x198] sm:$0xff] %v1011_v56 }
 0x1ff   : > { %v936_v57 = vpop.f32.mrf.mxu1 }
 0x200   : > { %1065 = vst [vmem:[%s1903_s23 + $0xa8] sm:$0xff] %v936_v57 }
 0x204   : > { %v1014_v58 = vpop.f32.mrf.mxu3 }
 0x205   : > { %1096 = vst [vmem:[%s1903_s23 + $0x1a0] sm:$0xff] %v1014_v58 }
 0x207   : > { %v939_v59 = vpop.f32.mrf.mxu1 }
 0x208   : > { %1066 = vst [vmem:[%s1903_s23 + $0xb0] sm:$0xff] %v939_v59 }
 0x20c   : > { %v1016_v60 = vpop.f32.mrf.mxu3 }
 0x20d   : > { %1097 = vst [vmem:[%s1903_s23 + $0x1a8] sm:$0xff] %v1016_v60 }
 0x20f   : > { %v941_v61 = vpop.f32.mrf.mxu1 }
 0x210   : > { %1067 = vst [vmem:[%s1903_s23 + $0xb8] sm:$0xff] %v941_v61 }
 0x214   : > { %v1019_v62 = vpop.f32.mrf.mxu3 }
 0x215   : > { %1098 = vst [vmem:[%s1903_s23 + $0x1b0] sm:$0xff] %v1019_v62 }
 0x217   : > { %v944_v63 = vpop.f32.mrf.mxu1 }
 0x218   : > { %1068 = vst [vmem:[%s1903_s23 + $0xc0] sm:$0xff] %v944_v63 }
 0x21c   : > { %v1021_v0 = vpop.f32.mrf.mxu3 }
 0x21d   : > { %1099 = vst [vmem:[%s1903_s23 + $0x1b8] sm:$0xff] %v1021_v0 }
 0x21f   : > { %v946_v1 = vpop.f32.mrf.mxu1 }
 0x220   : > { %1069 = vst [vmem:[%s1903_s23 + $0xc8] sm:$0xff] %v946_v1 }
 0x224   : > { %v1024_v2 = vpop.f32.mrf.mxu3 }
 0x225   : > { %1100 = vst [vmem:[%s1903_s23 + $0x1c0] sm:$0xff] %v1024_v2 }
 0x227   : > { %v949_v3 = vpop.f32.mrf.mxu1 }
 0x228   : > { %1070 = vst [vmem:[%s1903_s23 + $0xd0] sm:$0xff] %v949_v3 }
 0x22c   : > { %v1026_v4 = vpop.f32.mrf.mxu3 }
 0x22d   : > { %1101 = vst [vmem:[%s1903_s23 + $0x1c8] sm:$0xff] %v1026_v4 }
 0x22f   : > { %v951_v5 = vpop.f32.mrf.mxu1 }
 0x230   : > { %1071 = vst [vmem:[%s1903_s23 + $0xd8] sm:$0xff] %v951_v5 }
 0x234   : > { %v1029_v6 = vpop.f32.mrf.mxu3 }
 0x235   : > { %1102 = vst [vmem:[%s1903_s23 + $0x1d0] sm:$0xff] %v1029_v6 }
 0x237   : > { %v954_v7 = vpop.f32.mrf.mxu1 }
 0x238   : > { %1072 = vst [vmem:[%s1903_s23 + $0xe0] sm:$0xff] %v954_v7 }
 0x23c   : > { %v1031_v8 = vpop.f32.mrf.mxu3 }
 0x23d   : > { %1103 = vst [vmem:[%s1903_s23 + $0x1d8] sm:$0xff] %v1031_v8 }
 0x23f   : > { %v956_v9 = vpop.f32.mrf.mxu1 }
 0x240   : > { %1073 = vst [vmem:[%s1903_s23 + $0xe8] sm:$0xff] %v956_v9 }
 0x244   : > { %v1034_v10 = vpop.f32.mrf.mxu3 }
 0x245   : > { %1104 = vst [vmem:[%s1903_s23 + $0x1e0] sm:$0xff] %v1034_v10 }
 0x247   : > { %v959_v11 = vpop.f32.mrf.mxu1 }
 0x248   : > { %1074 = vst [vmem:[%s1903_s23 + $0xf0] sm:$0xff] %v959_v11 }
 0x24c   : > { %v1036_v12 = vpop.f32.mrf.mxu3 }
 0x24d   : > { %1105 = vst [vmem:[%s1903_s23 + $0x1e8] sm:$0xff] %v1036_v12 }
 0x24f   : > { %v961_v13 = vpop.f32.mrf.mxu1 }
 0x250   : > { %1075 = vst [vmem:[%s1903_s23 + $0xf8] sm:$0xff] %v961_v13 }
 0x254   : > { %v1039_v14 = vpop.f32.mrf.mxu3 }
 0x255   : > { %1106 = vst [vmem:[%s1903_s23 + $0x1f0] sm:$0xff] %v1039_v14 }
 0x25c   : > { %v1041_v15 = vpop.f32.mrf.mxu3 }
 0x25d   : > { %1107 = vst [vmem:[%s1903_s23 + $0x1f8] sm:$0xff] %v1041_v15 }
 0x25e   : > { %1680 = shalt.err (!%p1677_p10)
}
 0x25f   : > { %s1729_s11 = smov 128   ;;  %s1730_s25 = smov 8  }
 0x260   : > { %1502 = dma.vmem_to_hbm [thread:$0]  (%p1823_p3), %s1122_s28, 8192, %s1124_s4, %s1109_s7, %s1729_s11, %s1729_s11, %s1730_s25  }
 0x261 PF: > { %s1138_s5 = sand.u32 1, %s1711_s12   ;;  %p2012_p12 = scmp.ge.s32.totalorder %s1723_s15, 2 }
 0x262   : > { %s1139_s18 = scalar_lea.sflag [#allocation4], %s1138_s5 }
 0x263   : > { %p1516_p13 = pnand %p2012_p12, %p1786_p6 }
 0x265   : > { %p1517_p0 = pneg %p1516_p13 }
 0x267   : > { %1706 = dma.done.wait (%p1517_p0), %s1139_s18, 8192  }
 0x268   : > { %1708 = vsyncadd (%p1517_p0), %s1139_s18, 4294959104  ;;  %p17_p5 = scmp.ge.s32.totalorder %s1813_s6, 4   ;;  %s2013_s12 = smov %s1715_s13 }
 0x269   : > { %s2014_s13 = smov %s1719_s14  ;;  %s2015_s14 = smov %s1829_s10 }
 0x26a   : > { %s2016_s15 = smov %s1813_s6  ;;  %19 = sbr.rel (!%p17_p5) target bundleno = 6 (0x6), region = 85 }
 0x26f   :  { %1145 = vsyncpa [#allocation3], 1 }
 0x270   :  { %1147 = vsyncpa [#allocation3 + $0x1], 1 }
 0x271   :  { %1148 = vsyncpa [#allocation6], 1 }
 0x272   :  { %1149 = vsyncpa [#allocation4], 1 }
 0x273   :  { %1151 = vsyncpa [#allocation4 + $0x1], 1 }

</bundles_post_ra>
